<compile_context>
chip_gen: v5e
topology: v5e:2x2
jax: 0.10.0
libtpu: 0.0.40
codegen_flags: <defaults>
</compile_context>

<pallas_src>
import jax
import jax.numpy as jnp
from jax.experimental import pallas as pl
from jax.experimental.pallas import tpu as pltpu

# ---------------- problem sizes (small, consistent with the module) ----------
B = 8          # demo batch
P_DIM = 4
S_DIM = 16
V_DIM = 2
A_DIM = 4
HIDDEN = 32
DEPTH = 4
MAX_OUT = 1.0  # `_max` in the PyTorch module

# ---------------- single parameter-slab row layout (width = HIDDEN = 32) -----
# Matmul blocks start at multiples of 8 rows (clean sublane slices); bias /
# resweight rows are read one row at a time so their exact offsets are free.
R_SE = 0                                   # wse                       (16, 32)
R_H = R_SE + S_DIM                         # We[:HIDDEN]  (h part)     (32, 32)
R_P = R_H + HIDDEN                         # We p-rows                 ( 4, 32) in an 8-row block
R_V = R_P + 8                              # We v-rows                 ( 2, 32) in an 8-row block
R_VN = R_V + 8                             # We v_next-rows            ( 2, 32) in an 8-row block
R_MU = R_VN + 8                            # wmu (cols >= A_DIM zero)  (32, 32)
R_L = R_MU + HIDDEN                        # wl[i] at R_L + i*HIDDEN   (DEPTH*32, 32)
ROW_BSE = R_L + DEPTH * HIDDEN             # 232
ROW_BE = ROW_BSE + 1                       # 233
ROW_BL = ROW_BE + 1                        # 234 .. 234+DEPTH-1
ROW_BMU = ROW_BL + DEPTH                   # 238 (cols >= A_DIM zero)
ROW_RW = ROW_BMU + 1                       # 239 .. 239+DEPTH-1 (resweight, lane-replicated)
SLAB_ROWS = ((ROW_RW + DEPTH + 7) // 8) * 8  # 248


# ---------------- Pallas kernel ----------------------------------------------
def driver_net_kernel(s_ref, p_ref, v_ref, vn_ref, w_ref, mu_ref):
    f32 = jnp.float32

    s = s_ref[...]            # (tb, S_DIM)
    p = p_ref[...]            # (tb, P_DIM)
    v = v_ref[...]            # (tb, V_DIM)
    vn = vn_ref[...]          # (tb, V_DIM)

    bse = w_ref[ROW_BSE:ROW_BSE + 1, :]    # (1, HIDDEN)
    be = w_ref[ROW_BE:ROW_BE + 1, :]       # (1, HIDDEN)

    # --- s_encoder: relu(s @ Wse + bse) --------------------------------------
    h = jnp.maximum(
        jnp.dot(s, w_ref[R_SE:R_SE + S_DIM, :], preferred_element_type=f32) + bse,
        0.0)

    # --- encoder on torch.cat([h, p, v, v_next], 1) --------------------------
    # cat @ We == h @ We_h + p @ We_p + v @ We_v + v_next @ We_vn
    # (no concat anywhere; the tiny contractions ride on spare MXU slots)
    x = (jnp.dot(h, w_ref[R_H:R_H + HIDDEN, :], preferred_element_type=f32)
         + jnp.dot(p, w_ref[R_P:R_P + P_DIM, :], preferred_element_type=f32)
         + jnp.dot(v, w_ref[R_V:R_V + V_DIM, :], preferred_element_type=f32)
         + jnp.dot(vn, w_ref[R_VN:R_VN + V_DIM, :], preferred_element_type=f32)
         + be)
    x = jnp.maximum(x, 0.0)

    # --- residual ReLU stack: x = x + resweight[i] * relu(x @ W_i + b_i) -----
    # static unroll (DEPTH is compile-time); resweight rows are lane-replicated
    # so the scale is a plain (1, HIDDEN) broadcast multiply.
    for i in range(DEPTH):
        wi = w_ref[R_L + i * HIDDEN: R_L + (i + 1) * HIDDEN, :]
        bi = w_ref[ROW_BL + i: ROW_BL + i + 1, :]
        rwi = w_ref[ROW_RW + i: ROW_RW + i + 1, :]
        y = jnp.dot(x, wi, preferred_element_type=f32) + bi
        x = x + rwi * jnp.maximum(y, 0.0)

    # --- mu head: narrow (A_DIM-wide) output; tanh only on the real lanes ----
    mu_full = (jnp.dot(x, w_ref[R_MU:R_MU + HIDDEN, :], preferred_element_type=f32)
               + w_ref[ROW_BMU:ROW_BMU + 1, :])          # padded cols are exact zeros
    mu_ref[...] = MAX_OUT * jnp.tanh(mu_full[:, :A_DIM])


# ---------------- wrapper -----------------------------------------------------
def _choose_batch_tile(b):
    # Large rollout batches: big tiles amortize the ~0.35 us per-grid-step
    # overhead (sweep 512-2048 in production); always keep >= 2 grid steps so
    # ("parallel",) can shard the batch across v7x's two TensorCores.
    for tb in (1024, 512, 256, 128):
        if b >= 2 * tb:
            return tb
    if b > 8:
        return ((b + 15) // 16) * 8      # two roughly-equal sublane-aligned tiles
    return 8                             # tiny latency path (demo batch)


def driver_net_forward(p, s, v, v_next, packed):
    b = p.shape[0]
    tb = _choose_batch_tile(b)
    b_pad = pl.cdiv(b, tb) * tb          # pad-to-tile instead of whole-batch fallback
    grid = (b_pad // tb,)

    def prep(x):
        x = x.astype(jnp.float32)
        if b_pad != b:
            x = jnp.pad(x, ((0, b_pad - b), (0, 0)))
        return x

    s_, p_, v_, vn_ = prep(s), prep(p), prep(v), prep(v_next)

    mu = pl.pallas_call(
        driver_net_kernel,
        out_shape=jax.ShapeDtypeStruct((b_pad, A_DIM), jnp.float32),
        grid=grid,
        in_specs=[
            pl.BlockSpec((tb, S_DIM), lambda i: (i, 0)),
            pl.BlockSpec((tb, P_DIM), lambda i: (i, 0)),
            pl.BlockSpec((tb, V_DIM), lambda i: (i, 0)),
            pl.BlockSpec((tb, V_DIM), lambda i: (i, 0)),
            pl.BlockSpec((SLAB_ROWS, HIDDEN), lambda i: (0, 0)),   # resident params
        ],
        out_specs=pl.BlockSpec((tb, A_DIM), lambda i: (i, 0)),     # narrow mu output
        compiler_params=pltpu.CompilerParams(
            dimension_semantics=("parallel",)),
    )(s_, p_, v_, vn_, packed["wslab"])

    if b_pad != b:
        mu = mu[:b]
    # sigma_train=False: sigma = exp(sigma_param), input-independent -> wrapper only
    sigma = jnp.exp(jnp.broadcast_to(packed["sig"], (b, A_DIM)))
    return mu, sigma


# ---------------- deterministic parameter init --------------------------------
def init_params(key):
    ks = jax.random.split(key, 12)

    def lin(k, fan_in, fan_out, gain=1.0):
        # xavier-normal-ish init; weights stored as (in, out) so matmul is x @ W
        std = gain * (2.0 / (fan_in + fan_out)) ** 0.5
        return std * jax.random.normal(k, (fan_in, fan_out), jnp.float32)

    cat_dim = HIDDEN + P_DIM + 2 * V_DIM
    return {
        "wse": lin(ks[0], S_DIM, HIDDEN),
        "bse": 0.01 * jax.random.normal(ks[1], (1, HIDDEN), jnp.float32),
        "we": lin(ks[2], cat_dim, HIDDEN),
        "be": 0.01 * jax.random.normal(ks[3], (1, HIDDEN), jnp.float32),
        "wl": jnp.stack([lin(ks[4 + i], HIDDEN, HIDDEN, gain=2.0 ** 0.5)
                         for i in range(DEPTH)]),
        "bl": 0.01 * jax.random.normal(ks[8], (DEPTH, HIDDEN), jnp.float32),
        # torch init is zeros; use nonzero values so the residual path is exercised
        "rw": 0.1 * jnp.arange(1, DEPTH + 1, dtype=jnp.float32),
        "wmu": lin(ks[9], HIDDEN, A_DIM),
        "bmu": 0.01 * jax.random.normal(ks[10], (1, A_DIM), jnp.float32),
        # sigma parameter (torch (a_dim,1) viewed as (1,a_dim)); zeros -> sigma = 1
        "sig": jnp.zeros((1, A_DIM), jnp.float32),
    }


def pack_params(params):
    """Pack all logical parameters into one (SLAB_ROWS, HIDDEN) slab (off the hot path)."""
    f32 = jnp.float32
    we = params["we"]                               # (HIDDEN + P_DIM + 2*V_DIM, HIDDEN)

    slab = jnp.zeros((SLAB_ROWS, HIDDEN), f32)
    slab = slab.at[R_SE:R_SE + S_DIM].set(params["wse"])
    slab = slab.at[R_H:R_H + HIDDEN].set(we[:HIDDEN])
    slab = slab.at[R_P:R_P + P_DIM].set(we[HIDDEN:HIDDEN + P_DIM])
    slab = slab.at[R_V:R_V + V_DIM].set(we[HIDDEN + P_DIM:HIDDEN + P_DIM + V_DIM])
    slab = slab.at[R_VN:R_VN + V_DIM].set(we[HIDDEN + P_DIM + V_DIM:])
    slab = slab.at[R_MU:R_MU + HIDDEN, :A_DIM].set(params["wmu"])
    slab = slab.at[R_L:R_L + DEPTH * HIDDEN].set(
        params["wl"].reshape(DEPTH * HIDDEN, HIDDEN))
    slab = slab.at[ROW_BSE].set(params["bse"][0])
    slab = slab.at[ROW_BE].set(params["be"][0])
    slab = slab.at[ROW_BL:ROW_BL + DEPTH].set(params["bl"])
    slab = slab.at[ROW_BMU, :A_DIM].set(params["bmu"][0])
    slab = slab.at[ROW_RW:ROW_RW + DEPTH].set(
        jnp.broadcast_to(params["rw"][:, None], (DEPTH, HIDDEN)))

    return {"wslab": slab, "sig": params["sig"]}


# ---------------- pure-JAX reference (for verification) -----------------------
def reference_forward(p, s, v, v_next, params):
    h = jax.nn.relu(s @ params["wse"] + params["bse"])
    cat = jnp.concatenate([h, p, v, v_next], axis=1)
    x = jax.nn.relu(cat @ params["we"] + params["be"])
    for i in range(DEPTH):
        x = x + params["rw"][i] * jax.nn.relu(x @ params["wl"][i] + params["bl"][i])
    mu = MAX_OUT * jnp.tanh(x @ params["wmu"] + params["bmu"])
    sigma = jnp.exp(jnp.broadcast_to(params["sig"], mu.shape))
    return mu, sigma


if __name__ == "__main__":
    key = jax.random.PRNGKey(0)
    kp, ks_, kv, kvn, kparam = jax.random.split(key, 5)

    p = jax.random.normal(kp, (B, P_DIM), jnp.float32)
    s = jax.random.normal(ks_, (B, S_DIM), jnp.float32)
    v = jax.random.normal(kv, (B, V_DIM), jnp.float32)
    v_next = jax.random.normal(kvn, (B, V_DIM), jnp.float32)

    params = init_params(kparam)
    packed = pack_params(params)

    fwd = jax.jit(driver_net_forward)
    mu, sigma = fwd(p, s, v, v_next, packed)
    jax.block_until_ready((mu, sigma))

    mu_ref, sigma_ref = reference_forward(p, s, v, v_next, params)
    assert mu.shape == (B, A_DIM) and sigma.shape == (B, A_DIM)
    assert jnp.allclose(mu, mu_ref, atol=1e-5, rtol=1e-5)
    assert jnp.allclose(sigma, sigma_ref, atol=1e-5, rtol=1e-5)

    print("KERNEL_OK")
</pallas_src>

<mosaic_0001>
module attributes {stable_mosaic.version = 11 : i64} {
  func.func @driver_net_kernel(%arg0: i32, %arg1: memref<8x16xf32, #tpu.memory_space<vmem>>, %arg2: memref<8x4xf32, #tpu.memory_space<vmem>>, %arg3: memref<8x2xf32, #tpu.memory_space<vmem>>, %arg4: memref<8x2xf32, #tpu.memory_space<vmem>>, %arg5: memref<248x32xf32, #tpu.memory_space<vmem>>, %arg6: memref<8x4xf32, #tpu.memory_space<vmem>>) attributes {dimension_semantics = [#tpu.dimension_semantics<parallel>], iteration_bounds = array<i64: 1>, scalar_prefetch = 0 : i64, scratch_operands = 0 : i64, tpu.core_type = #tpu.core_type<tc>, window_params = [{transform_indices = @transform_0, window_bounds = array<i64: 8, 16>}, {transform_indices = @transform_1, window_bounds = array<i64: 8, 4>}, {transform_indices = @transform_2, window_bounds = array<i64: 8, 2>}, {transform_indices = @transform_3, window_bounds = array<i64: 8, 2>}, {pipeline_mode = #tpu.pipeline_mode<synchronous>, transform_indices = @transform_4, window_bounds = array<i64: 248, 32>}, {transform_indices = @transform_5, window_bounds = array<i64: 8, 4>}]} {
    %c0 = arith.constant 0 : index
    %c0_0 = arith.constant 0 : index
    %0 = vector.load %arg1[%c0, %c0_0] : memref<8x16xf32, #tpu.memory_space<vmem>>, vector<8x16xf32>
    %c0_1 = arith.constant 0 : index
    %c0_2 = arith.constant 0 : index
    %1 = vector.load %arg2[%c0_1, %c0_2] : memref<8x4xf32, #tpu.memory_space<vmem>>, vector<8x4xf32>
    %c0_3 = arith.constant 0 : index
    %c0_4 = arith.constant 0 : index
    %2 = vector.load %arg3[%c0_3, %c0_4] : memref<8x2xf32, #tpu.memory_space<vmem>>, vector<8x2xf32>
    %c0_5 = arith.constant 0 : index
    %c0_6 = arith.constant 0 : index
    %3 = vector.load %arg4[%c0_5, %c0_6] : memref<8x2xf32, #tpu.memory_space<vmem>>, vector<8x2xf32>
    %c232 = arith.constant 232 : index
    %c0_7 = arith.constant 0 : index
    %4 = vector.load %arg5[%c232, %c0_7] : memref<248x32xf32, #tpu.memory_space<vmem>>, vector<1x32xf32>
    %c233 = arith.constant 233 : index
    %c0_8 = arith.constant 0 : index
    %5 = vector.load %arg5[%c233, %c0_8] : memref<248x32xf32, #tpu.memory_space<vmem>>, vector<1x32xf32>
    %c0_9 = arith.constant 0 : index
    %c0_10 = arith.constant 0 : index
    %6 = vector.load %arg5[%c0_9, %c0_10] : memref<248x32xf32, #tpu.memory_space<vmem>>, vector<16x32xf32>
    %cst = arith.constant dense<0.000000e+00> : vector<8x32xf32>
    %7 = tpu.matmul %0, %6, %cst {dimension_numbers = #tpu.dot_dimension_numbers<[1], [0], [0], [1], [0, 0, 1, 1], [], []>} : vector<8x16xf32>, vector<16x32xf32>, vector<8x32xf32> -> vector<8x32xf32>
    %8 = vector.broadcast %4 : vector<1x32xf32> to vector<8x32xf32>
    %9 = arith.addf %7, %8 : vector<8x32xf32>
    %cst_11 = arith.constant 0.000000e+00 : f32
    %10 = vector.broadcast %cst_11 : f32 to vector<8x32xf32>
    %11 = arith.maximumf %9, %10 : vector<8x32xf32>
    %c16 = arith.constant 16 : index
    %c0_12 = arith.constant 0 : index
    %12 = vector.load %arg5[%c16, %c0_12] : memref<248x32xf32, #tpu.memory_space<vmem>>, vector<32x32xf32>
    %cst_13 = arith.constant dense<0.000000e+00> : vector<8x32xf32>
    %13 = tpu.matmul %11, %12, %cst_13 {dimension_numbers = #tpu.dot_dimension_numbers<[1], [0], [0], [1], [0, 0, 1, 1], [], []>} : vector<8x32xf32>, vector<32x32xf32>, vector<8x32xf32> -> vector<8x32xf32>
    %c48 = arith.constant 48 : index
    %c0_14 = arith.constant 0 : index
    %14 = vector.load %arg5[%c48, %c0_14] : memref<248x32xf32, #tpu.memory_space<vmem>>, vector<4x32xf32>
    %cst_15 = arith.constant dense<0.000000e+00> : vector<8x32xf32>
    %15 = tpu.matmul %1, %14, %cst_15 {dimension_numbers = #tpu.dot_dimension_numbers<[1], [0], [0], [1], [0, 0, 1, 1], [], []>} : vector<8x4xf32>, vector<4x32xf32>, vector<8x32xf32> -> vector<8x32xf32>
    %16 = arith.addf %13, %15 : vector<8x32xf32>
    %c56 = arith.constant 56 : index
    %c0_16 = arith.constant 0 : index
    %17 = vector.load %arg5[%c56, %c0_16] : memref<248x32xf32, #tpu.memory_space<vmem>>, vector<2x32xf32>
    %cst_17 = arith.constant dense<0.000000e+00> : vector<8x32xf32>
    %18 = tpu.matmul %2, %17, %cst_17 {dimension_numbers = #tpu.dot_dimension_numbers<[1], [0], [0], [1], [0, 0, 1, 1], [], []>} : vector<8x2xf32>, vector<2x32xf32>, vector<8x32xf32> -> vector<8x32xf32>
    %19 = arith.addf %16, %18 : vector<8x32xf32>
    %c64 = arith.constant 64 : index
    %c0_18 = arith.constant 0 : index
    %20 = vector.load %arg5[%c64, %c0_18] : memref<248x32xf32, #tpu.memory_space<vmem>>, vector<2x32xf32>
    %cst_19 = arith.constant dense<0.000000e+00> : vector<8x32xf32>
    %21 = tpu.matmul %3, %20, %cst_19 {dimension_numbers = #tpu.dot_dimension_numbers<[1], [0], [0], [1], [0, 0, 1, 1], [], []>} : vector<8x2xf32>, vector<2x32xf32>, vector<8x32xf32> -> vector<8x32xf32>
    %22 = arith.addf %19, %21 : vector<8x32xf32>
    %23 = vector.broadcast %5 : vector<1x32xf32> to vector<8x32xf32>
    %24 = arith.addf %22, %23 : vector<8x32xf32>
    %cst_20 = arith.constant 0.000000e+00 : f32
    %25 = vector.broadcast %cst_20 : f32 to vector<8x32xf32>
    %26 = arith.maximumf %24, %25 : vector<8x32xf32>
    %c104 = arith.constant 104 : index
    %c0_21 = arith.constant 0 : index
    %27 = vector.load %arg5[%c104, %c0_21] : memref<248x32xf32, #tpu.memory_space<vmem>>, vector<32x32xf32>
    %c234 = arith.constant 234 : index
    %c0_22 = arith.constant 0 : index
    %28 = vector.load %arg5[%c234, %c0_22] : memref<248x32xf32, #tpu.memory_space<vmem>>, vector<1x32xf32>
    %c239 = arith.constant 239 : index
    %c0_23 = arith.constant 0 : index
    %29 = vector.load %arg5[%c239, %c0_23] : memref<248x32xf32, #tpu.memory_space<vmem>>, vector<1x32xf32>
    %cst_24 = arith.constant dense<0.000000e+00> : vector<8x32xf32>
    %30 = tpu.matmul %26, %27, %cst_24 {dimension_numbers = #tpu.dot_dimension_numbers<[1], [0], [0], [1], [0, 0, 1, 1], [], []>} : vector<8x32xf32>, vector<32x32xf32>, vector<8x32xf32> -> vector<8x32xf32>
    %31 = vector.broadcast %28 : vector<1x32xf32> to vector<8x32xf32>
    %32 = arith.addf %30, %31 : vector<8x32xf32>
    %cst_25 = arith.constant 0.000000e+00 : f32
    %33 = vector.broadcast %cst_25 : f32 to vector<8x32xf32>
    %34 = arith.maximumf %32, %33 : vector<8x32xf32>
    %35 = vector.broadcast %29 : vector<1x32xf32> to vector<8x32xf32>
    %36 = arith.mulf %35, %34 : vector<8x32xf32>
    %37 = arith.addf %26, %36 : vector<8x32xf32>
    %c136 = arith.constant 136 : index
    %c0_26 = arith.constant 0 : index
    %38 = vector.load %arg5[%c136, %c0_26] : memref<248x32xf32, #tpu.memory_space<vmem>>, vector<32x32xf32>
    %c235 = arith.constant 235 : index
    %c0_27 = arith.constant 0 : index
    %39 = vector.load %arg5[%c235, %c0_27] : memref<248x32xf32, #tpu.memory_space<vmem>>, vector<1x32xf32>
    %c240 = arith.constant 240 : index
    %c0_28 = arith.constant 0 : index
    %40 = vector.load %arg5[%c240, %c0_28] : memref<248x32xf32, #tpu.memory_space<vmem>>, vector<1x32xf32>
    %cst_29 = arith.constant dense<0.000000e+00> : vector<8x32xf32>
    %41 = tpu.matmul %37, %38, %cst_29 {dimension_numbers = #tpu.dot_dimension_numbers<[1], [0], [0], [1], [0, 0, 1, 1], [], []>} : vector<8x32xf32>, vector<32x32xf32>, vector<8x32xf32> -> vector<8x32xf32>
    %42 = vector.broadcast %39 : vector<1x32xf32> to vector<8x32xf32>
    %43 = arith.addf %41, %42 : vector<8x32xf32>
    %cst_30 = arith.constant 0.000000e+00 : f32
    %44 = vector.broadcast %cst_30 : f32 to vector<8x32xf32>
    %45 = arith.maximumf %43, %44 : vector<8x32xf32>
    %46 = vector.broadcast %40 : vector<1x32xf32> to vector<8x32xf32>
    %47 = arith.mulf %46, %45 : vector<8x32xf32>
    %48 = arith.addf %37, %47 : vector<8x32xf32>
    %c168 = arith.constant 168 : index
    %c0_31 = arith.constant 0 : index
    %49 = vector.load %arg5[%c168, %c0_31] : memref<248x32xf32, #tpu.memory_space<vmem>>, vector<32x32xf32>
    %c236 = arith.constant 236 : index
    %c0_32 = arith.constant 0 : index
    %50 = vector.load %arg5[%c236, %c0_32] : memref<248x32xf32, #tpu.memory_space<vmem>>, vector<1x32xf32>
    %c241 = arith.constant 241 : index
    %c0_33 = arith.constant 0 : index
    %51 = vector.load %arg5[%c241, %c0_33] : memref<248x32xf32, #tpu.memory_space<vmem>>, vector<1x32xf32>
    %cst_34 = arith.constant dense<0.000000e+00> : vector<8x32xf32>
    %52 = tpu.matmul %48, %49, %cst_34 {dimension_numbers = #tpu.dot_dimension_numbers<[1], [0], [0], [1], [0, 0, 1, 1], [], []>} : vector<8x32xf32>, vector<32x32xf32>, vector<8x32xf32> -> vector<8x32xf32>
    %53 = vector.broadcast %50 : vector<1x32xf32> to vector<8x32xf32>
    %54 = arith.addf %52, %53 : vector<8x32xf32>
    %cst_35 = arith.constant 0.000000e+00 : f32
    %55 = vector.broadcast %cst_35 : f32 to vector<8x32xf32>
    %56 = arith.maximumf %54, %55 : vector<8x32xf32>
    %57 = vector.broadcast %51 : vector<1x32xf32> to vector<8x32xf32>
    %58 = arith.mulf %57, %56 : vector<8x32xf32>
    %59 = arith.addf %48, %58 : vector<8x32xf32>
    %c200 = arith.constant 200 : index
    %c0_36 = arith.constant 0 : index
    %60 = vector.load %arg5[%c200, %c0_36] : memref<248x32xf32, #tpu.memory_space<vmem>>, vector<32x32xf32>
    %c237 = arith.constant 237 : index
    %c0_37 = arith.constant 0 : index
    %61 = vector.load %arg5[%c237, %c0_37] : memref<248x32xf32, #tpu.memory_space<vmem>>, vector<1x32xf32>
    %c242 = arith.constant 242 : index
    %c0_38 = arith.constant 0 : index
    %62 = vector.load %arg5[%c242, %c0_38] : memref<248x32xf32, #tpu.memory_space<vmem>>, vector<1x32xf32>
    %cst_39 = arith.constant dense<0.000000e+00> : vector<8x32xf32>
    %63 = tpu.matmul %59, %60, %cst_39 {dimension_numbers = #tpu.dot_dimension_numbers<[1], [0], [0], [1], [0, 0, 1, 1], [], []>} : vector<8x32xf32>, vector<32x32xf32>, vector<8x32xf32> -> vector<8x32xf32>
    %64 = vector.broadcast %61 : vector<1x32xf32> to vector<8x32xf32>
    %65 = arith.addf %63, %64 : vector<8x32xf32>
    %cst_40 = arith.constant 0.000000e+00 : f32
    %66 = vector.broadcast %cst_40 : f32 to vector<8x32xf32>
    %67 = arith.maximumf %65, %66 : vector<8x32xf32>
    %68 = vector.broadcast %62 : vector<1x32xf32> to vector<8x32xf32>
    %69 = arith.mulf %68, %67 : vector<8x32xf32>
    %70 = arith.addf %59, %69 : vector<8x32xf32>
    %c72 = arith.constant 72 : index
    %c0_41 = arith.constant 0 : index
    %71 = vector.load %arg5[%c72, %c0_41] : memref<248x32xf32, #tpu.memory_space<vmem>>, vector<32x32xf32>
    %cst_42 = arith.constant dense<0.000000e+00> : vector<8x32xf32>
    %72 = tpu.matmul %70, %71, %cst_42 {dimension_numbers = #tpu.dot_dimension_numbers<[1], [0], [0], [1], [0, 0, 1, 1], [], []>} : vector<8x32xf32>, vector<32x32xf32>, vector<8x32xf32> -> vector<8x32xf32>
    %c238 = arith.constant 238 : index
    %c0_43 = arith.constant 0 : index
    %73 = vector.load %arg5[%c238, %c0_43] : memref<248x32xf32, #tpu.memory_space<vmem>>, vector<1x32xf32>
    %74 = vector.broadcast %73 : vector<1x32xf32> to vector<8x32xf32>
    %75 = arith.addf %72, %74 : vector<8x32xf32>
    %76 = vector.extract_strided_slice %75 {offsets = [0, 0], sizes = [8, 4], strides = [1, 1]} : vector<8x32xf32> to vector<8x4xf32>
    %77 = math.tanh %76 : vector<8x4xf32>
    %cst_44 = arith.constant 1.000000e+00 : f32
    %78 = vector.broadcast %cst_44 : f32 to vector<8x4xf32>
    %79 = arith.mulf %78, %77 : vector<8x4xf32>
    %c0_45 = arith.constant 0 : index
    %c0_46 = arith.constant 0 : index
    %80 = vector.load %arg6[%c0_45, %c0_46] : memref<8x4xf32, #tpu.memory_space<vmem>>, vector<8x4xf32>
    tpu.vector_store %arg6[%c0_45, %c0_46], %79 {strides = array<i32>} : memref<8x4xf32, #tpu.memory_space<vmem>>, vector<8x4xf32>,
    return
  }
  func.func @transform_0(%arg0: i32) -> (i32, i32) {
    %c0_i32 = arith.constant 0 : i32
    %c0_i32_0 = arith.constant 0 : i32
    return %arg0, %c0_i32 : i32, i32
  }
  func.func @transform_1(%arg0: i32) -> (i32, i32) {
    %c0_i32 = arith.constant 0 : i32
    %c0_i32_0 = arith.constant 0 : i32
    return %arg0, %c0_i32 : i32, i32
  }
  func.func @transform_2(%arg0: i32) -> (i32, i32) {
    %c0_i32 = arith.constant 0 : i32
    %c0_i32_0 = arith.constant 0 : i32
    return %arg0, %c0_i32 : i32, i32
  }
  func.func @transform_3(%arg0: i32) -> (i32, i32) {
    %c0_i32 = arith.constant 0 : i32
    %c0_i32_0 = arith.constant 0 : i32
    return %arg0, %c0_i32 : i32, i32
  }
  func.func @transform_4(%arg0: i32) -> (i32, i32) {
    %c0_i32 = arith.constant 0 : i32
    %c0_i32_0 = arith.constant 0 : i32
    %c0_i32_1 = arith.constant 0 : i32
    return %c0_i32, %c0_i32_0 : i32, i32
  }
  func.func @transform_5(%arg0: i32) -> (i32, i32) {
    %c0_i32 = arith.constant 0 : i32
    %c0_i32_0 = arith.constant 0 : i32
    return %arg0, %c0_i32 : i32, i32
  }
}

</mosaic_0001>

<bundles_post_ra>
// kernel: driver_net_forward.1
= control target key start
LH: loop header
LB: loop body
LE: loop exit
PB: predicated region body
PF: predicated region fallthrough
CT: control target
= control target key end

     0   :  { %vm29_vm0 = vcmask 130048   ;;  %vm63_vm1 = vcmask 1043456   ;;  %vm116_vm2 = vcmask 1041408   ;;  %vm59_vm3 = vcmask 31744   ;;  %s542_s4 = inlined_call_operand.vmem [shape: f32[248,32], index: 4, kind: input, shape index: {}]   ;;  %s543_s0 = inlined_call_operand.vmem [shape: f32[8,16], index: 0, kind: input, shape index: {}]   ;;  %s544_s1 = inlined_call_operand.vmem [shape: f32[8,4], index: 1, kind: input, shape index: {}]   ;;  %s545_s2 = inlined_call_operand.vmem [shape: f32[8,2], index: 2, kind: input, shape index: {}]   ;;  %s546_s3 = inlined_call_operand.vmem [shape: f32[8,2], index: 3, kind: input, shape index: {}]   ;;  %s547_s5 = inlined_call_operand.vmem [shape: f32[8,4], index: 5, kind: output, shape index: {}]  }
   0x1   :  { %v27_v0 = vld [vmem:[%s542_s4 + $0x8] sm:$0xff]  ;;  %v26_v1 = vld [vmem:[%s542_s4] sm:$0xff]  ;;  %v55_v5 = vld [vmem:[%s542_s4 + $0x18] sm:$0xff]  ;;  %vm112_vm4 = vcmask 15360   ;;  %vm87_vm5 = vcmask 261120  }
   0x2   :  { %47 = vmatpush.msra.mxu0 %v27_v0  ;;  %v20_v2 = vld [vmem:[%s543_s0] sm:$0xff]  ;;  %v57_v3 = vld [vmem:[%s542_s4 + $0x28] sm:$0xff]  ;;  %v54_v6 = vld [vmem:[%s542_s4 + $0x10] sm:$0xff] }
   0x3   :  { %103 = vmatpush.msra.mxu2 %v57_v3  ;;  %v56_v4 = vld [vmem:[%s542_s4 + $0x20] sm:$0xff]  ;;  %v58_v7 = vld [vmem:[%s542_s4 + $0x30] sm:$0xf]  ;;  %v111_v8 = vld [vmem:[%s542_s4 + $0x38] sm:$0x3] }
   0x4   :  { %48 = vmatpush.msra.mxu0 %v26_v1  ;;  %344 = vmatpush.msk.msra.mxu1 %vm63_vm1, %v58_v7  ;;  %v21_v9 = vld [vmem:[%s544_s1] sm:$0xff]  ;;  %v356_v13 = vld [vmem:[%s542_s4 + $0xe8] ss:$0 sm:$0xff]  ;;  %v174_v18 = vld [vmem:[%s542_s4 + $0x78] sm:$0xff] }
   0x5   :  { %343 = vmatmul.msk.f32.vlgmr.msra.gmra.mxu0 %vm29_vm0, %v20_v2  ;;  %104 = vmatpush.msra.mxu2 %v56_v4  ;;  %v22_v10 = vld [vmem:[%s545_s2] sm:$0xff]  ;;  %v173_v19 = vld [vmem:[%s542_s4 + $0x70] sm:$0xff]  ;;  %v172_v20 = vld [vmem:[%s542_s4 + $0x68] sm:$0xff] }
   0x6   :  { %347 = vmatpush.msk.msra.mxu3 %vm116_vm2, %v111_v8  ;;  %v141_v11 = vld [vmem:[%s542_s4 + $0x40] sm:$0x3]  ;;  %345 = vmatmul.msk.f32.vlgmr.msra.gmra.mxu1 %vm59_vm3, %v21_v9  ;;  %v357_v27 = vld [vmem:[%s542_s4 + $0xe9] ss:$0 sm:$0xff]  ;;  %v208_v32 = vld [vmem:[%s542_s4 + $0x98] sm:$0xff] }
   0x7   :  { %105 = vmatpush.msra.mxu2 %v55_v5  ;;  %348 = vmatmul.msk.f32.vlgmr.msra.gmra.mxu3 %vm112_vm4, %v22_v10  ;;  %v23_v12 = vld [vmem:[%s546_s3] sm:$0xff]  ;;  %v207_v33 = vld [vmem:[%s542_s4 + $0x90] sm:$0xff]  ;;  %v206_v34 = vld [vmem:[%s542_s4 + $0x88] sm:$0xff] }
   0x8   :  { %349 = vmatpush.msk.msrb.mxu1 %vm116_vm2, %v141_v11  ;;  %v175_v17 = vld [vmem:[%s542_s4 + $0x80] sm:$0xff]  ;;  %v358_v35 = vld [vmem:[%s542_s4 + $0xea] ss:$0 sm:$0xff]  ;;  %v359_v38 = vld [vmem:[%s542_s4 + $0xef] ss:$0 sm:$0xff] }
   0x9   :  { %106 = vmatpush.msra.mxu2 %v54_v6  ;;  %194 = vmatpush.msrb.mxu3 %v175_v17  ;;  %v209_v31 = vld [vmem:[%s542_s4 + $0xa0] sm:$0xff]  ;;  %v242_v43 = vld [vmem:[%s542_s4 + $0xb8] sm:$0xff]  ;;  %v241_v44 = vld [vmem:[%s542_s4 + $0xb0] sm:$0xff] }
   0xa   :  { %228 = vmatpush.msrb.mxu0 %v209_v31  ;;  %v243_v42 = vld [vmem:[%s542_s4 + $0xc0] sm:$0xff]  ;;  %v240_v45 = vld [vmem:[%s542_s4 + $0xa8] sm:$0xff]  ;;  %v361_v49 = vld [vmem:[%s542_s4 + $0xf0] ss:$0 sm:$0xff] }
   0xb   :  { %195 = vmatpush.msrb.mxu3 %v174_v18  ;;  %262 = vmatpush.msrb.mxu2 %v243_v42  ;;  %v360_v46 = vld [vmem:[%s542_s4 + $0xeb] ss:$0 sm:$0xff]  ;;  %v277_v53 = vld [vmem:[%s542_s4 + $0xe0] sm:$0xff]  ;;  %v276_v54 = vld [vmem:[%s542_s4 + $0xd8] sm:$0xff] }
   0xc   :  { %229 = vmatpush.msrb.mxu0 %v208_v32  ;;  %296 = vmatpush.msra.mxu1 %v277_v53  ;;  %v275_v55 = vld [vmem:[%s542_s4 + $0xd0] sm:$0xff]  ;;  %v274_v56 = vld [vmem:[%s542_s4 + $0xc8] sm:$0xff]  ;;  %v311_v0 = vld [vmem:[%s542_s4 + $0x60] sm:$0xff] }
   0xd   :  { %196 = vmatpush.msrb.mxu3 %v173_v19  ;;  %263 = vmatpush.msrb.mxu2 %v242_v43  ;;  %v362_v57 = vld [vmem:[%s542_s4 + $0xec] ss:$0 sm:$0xff]  ;;  %v363_v60 = vld [vmem:[%s542_s4 + $0xf1] ss:$0 sm:$0xff]  ;;  %v310_v1 = vld [vmem:[%s542_s4 + $0x58] sm:$0xff] }
   0xe   :  { %350 = vmatmul.msk.f32.vlgmr.msrb.gmra.mxu1 %vm112_vm4, %v23_v12  ;;  %230 = vmatpush.msrb.mxu0 %v207_v33  ;;  %v309_v2 = vld [vmem:[%s542_s4 + $0x50] sm:$0xff]  ;;  %v308_v3 = vld [vmem:[%s542_s4 + $0x48] sm:$0xff] }
   0xf   :  { %197 = vmatpush.msrb.mxu3 %v172_v20  ;;  %264 = vmatpush.msrb.mxu2 %v241_v44  ;;  %v364_v4 = vld [vmem:[%s542_s4 + $0xed] ss:$0 sm:$0xff]  ;;  %v365_v7 = vld [vmem:[%s542_s4 + $0xf2] ss:$0 sm:$0xff]  ;;  %v366_v11 = vld [vmem:[%s542_s4 + $0xee] ss:$0 sm:$0xff] }
  0x10   :  { %231 = vmatpush.msrb.mxu0 %v206_v34  ;;  %297 = vmatpush.msra.mxu1 %v276_v54 }
  0x11   :  { %265 = vmatpush.msrb.mxu2 %v240_v45  ;;  %329 = vmatpush.msra.mxu3 %v311_v0 }
  0x12   :  { %298 = vmatpush.msra.mxu1 %v275_v55 }
  0x13   :  { %330 = vmatpush.msra.mxu3 %v310_v1 }
  0x14   :  { %299 = vmatpush.msra.mxu1 %v274_v56 }
  0x15   :  { %331 = vmatpush.msra.mxu3 %v309_v2 }
  0x17   :  { %332 = vmatpush.msra.mxu3 %v308_v3 }
  0x82   :  { %v50_v14 = vpop.f32.mrf.mxu0 }
  0x83   :  { %v51_v15 = vadd.f32 %v356_v13, %v50_v14  ;;  %v84_v21 = vpop.f32.mrf.mxu1 }
  0x85   :  { %v53_v16 = vmax.f32 %v51_v15, 0.0 }
  0x87   :  { %346 = vmatmul.msk.f32.vlgmr.msra.gmra.mxu2 %vm87_vm5, %v53_v16 }
  0x8a   :  { %v137_v23 = vpop.f32.mrf.mxu3 }
  0x8b   :  { %v165_v25 = vpop.f32.mrf.mxu1 }
 0x10a   :  { %v108_v22 = vpop.f32.mrf.mxu2 }
 0x10b   :  { %v109_v24 = vadd.f32 %v108_v22, %v84_v21 }
 0x10d   :  { %v140_v26 = vadd.f32 %v137_v23, %v109_v24 }
 0x10f   :  { %v168_v28 = vadd.f32 %v165_v25, %v140_v26 }
 0x111   :  { %v170_v29 = vadd.f32 %v357_v27, %v168_v28 }
 0x113   :  { %v171_v30 = vmax.f32 %v170_v29, 0.0 }
 0x115   :  { %351 = vmatmul.msk.f32.vlgmr.msrb.gmra.mxu3 %vm87_vm5, %v171_v30 }
 0x198   :  { %v199_v36 = vpop.f32.mrf.mxu3 }
 0x199   :  { %v200_v37 = vadd.f32 %v358_v35, %v199_v36 }
 0x19b   :  { %v202_v39 = vmax.f32 %v200_v37, 0.0 }
 0x19d   :  { %v204_v40 = vmul.f32 %v359_v38, %v202_v39 }
 0x19f   :  { %v205_v41 = vadd.f32 %v204_v40, %v171_v30 }
 0x1a1   :  { %352 = vmatmul.msk.f32.vlgmr.msrb.gmra.mxu0 %vm87_vm5, %v205_v41 }
 0x21e   :  { %v233_v47 = vpop.f32.mrf.mxu0 }
 0x21f   :  { %v234_v48 = vadd.f32 %v360_v46, %v233_v47 }
 0x221   :  { %v236_v50 = vmax.f32 %v234_v48, 0.0 }
 0x223   :  { %v238_v51 = vmul.f32 %v361_v49, %v236_v50 }
 0x225   :  { %v239_v52 = vadd.f32 %v238_v51, %v205_v41 }
 0x227   :  { %353 = vmatmul.msk.f32.vlgmr.msrb.gmra.mxu2 %vm87_vm5, %v239_v52 }
 0x2aa   :  { %v267_v58 = vpop.f32.mrf.mxu2 }
 0x2ab   :  { %v268_v59 = vadd.f32 %v362_v57, %v267_v58 }
 0x2ad   :  { %v270_v61 = vmax.f32 %v268_v59, 0.0 }
 0x2af   :  { %v272_v62 = vmul.f32 %v363_v60, %v270_v61 }
 0x2b1   :  { %v273_v63 = vadd.f32 %v272_v62, %v239_v52 }
 0x2b3   :  { %354 = vmatmul.msk.f32.vlgmr.msra.gmra.mxu1 %vm87_vm5, %v273_v63 }
 0x330   :  { %v301_v5 = vpop.f32.mrf.mxu1 }
 0x331   :  { %v302_v6 = vadd.f32 %v364_v4, %v301_v5 }
 0x333   :  { %v304_v8 = vmax.f32 %v302_v6, 0.0 }
 0x335   :  { %v306_v9 = vmul.f32 %v365_v7, %v304_v8 }
 0x337   :  { %v307_v10 = vadd.f32 %v306_v9, %v273_v63 }
 0x339   :  { %355 = vmatmul.msk.f32.vlgmr.msra.gmra.mxu3 %vm87_vm5, %v307_v10 }
 0x3bc   :  { %v334_v12 = vpop.f32.mrf.mxu3 }
 0x3bd   :  { %v335_v13 = vadd.f32 %v366_v11, %v334_v12 }
 0x3bf   :  { %367 = vtanh.f32 %v335_v13 }
 0x3c5   :  { %v368_v14 = vpop.eup %367 }
 0x3c6   :  { %338 = vst.msk [vmem:[%s547_s5] sm:$0xff] %vm59_vm3, %v368_v14 }

</bundles_post_ra>
